<compile_context>
chip_gen: v7x
topology: tpu7x:2x2x1
jax: 0.10.0
libtpu: 0.0.40
codegen_flags: <defaults>
</compile_context>

<pallas_src>
import functools

import jax
import jax.numpy as jnp
from jax.experimental import pallas as pl
from jax.experimental.pallas import tpu as pltpu

_LANES = 128


# ----------------------------- kernels ---------------------------------------


def _layernorm_kernel(x_ref, a_ref, b_ref, o_ref, *, eps, approx_recip):
    """Full-width path: one logical row per block row (F is the lane axis)."""
    x = x_ref[...].astype(jnp.float32)                      # (tile_rows, F)
    n = x.shape[-1]
    inv_n = 1.0 / n                                         # trace-time consts
    inv_nm1 = (1.0 / (n - 1)) if n > 1 else 0.0             # unbiased (Bessel)

    mean = jnp.sum(x, axis=-1, keepdims=True) * inv_n       # (tile_rows, 1)
    var = jnp.sum((x - mean) * (x - mean), axis=-1, keepdims=True) * inv_nm1
    std = jnp.sqrt(var)

    # Per-row reciprocal instead of a per-element divide across the tile.
    if approx_recip:
        inv = pl.reciprocal(std + eps, approx=True)         # EUP slot
    else:
        inv = 1.0 / (std + eps)                             # exact; tiny operand

    a = a_ref[...].astype(jnp.float32)                      # (1, F)
    b = b_ref[...].astype(jnp.float32)                      # (1, F)
    # Recompute (x - mean) here instead of keeping `diff` live across the
    # variance reduction (halves the full-tile f32 temporaries).
    o_ref[...] = (((x - mean) * inv) * a + b).astype(o_ref.dtype)


def _layernorm_packed_kernel(x_ref, a_ref, b_ref, o_ref, *, eps, features,
                             pack, approx_recip):
    """Small-F path: `pack` logical rows packed along the 128-lane axis.

    Block layout is (tile_rows, pack * features); lanes [s*F, (s+1)*F) of a
    packed row hold logical row (row * pack + s).  a/b arrive pre-tiled.
    """
    x = x_ref[...].astype(jnp.float32)                      # (T, pack*F)
    a = a_ref[...].astype(jnp.float32)                      # (1, pack*F)
    b = b_ref[...].astype(jnp.float32)
    inv_n = 1.0 / features
    inv_nm1 = (1.0 / (features - 1)) if features > 1 else 0.0

    pieces = []
    for s in range(pack):                                   # unrolled, pack <= 16
        lo = s * features
        xs = x[:, lo:lo + features]                         # (T, F) static slice
        a_s = a[:, lo:lo + features]
        b_s = b[:, lo:lo + features]
        mean = jnp.sum(xs, axis=-1, keepdims=True) * inv_n
        var = jnp.sum((xs - mean) * (xs - mean), axis=-1, keepdims=True) * inv_nm1
        std = jnp.sqrt(var)
        if approx_recip:
            inv = pl.reciprocal(std + eps, approx=True)
        else:
            inv = 1.0 / (std + eps)
        pieces.append(((xs - mean) * inv) * a_s + b_s)

    y = jnp.concatenate(pieces, axis=-1)                    # (T, pack*F), lane-dense
    o_ref[...] = y.astype(o_ref.dtype)


# ----------------------------- tiling helpers --------------------------------


def _sublane_multiple(itemsize):
    # f32 -> 8, bf16 -> 16, int8/fp8 -> 32 (sub-32-bit packs along sublanes).
    return 8 * max(1, 4 // int(itemsize))


def _vmem_limit_bytes():
    """Per-generation scoped-VMEM limit: half of physical VMEM."""
    try:
        phys = int(pltpu.get_tpu_info().vmem_capacity_bytes)
    except Exception:
        phys = 64 * 1024 * 1024  # conservative fallback (v7x physical per-TC)
    # v5e/v6e: 128 MiB phys -> 64 MiB limit; v7x: 64 MiB phys -> 32 MiB limit.
    return max(phys // 2, 16 * 1024 * 1024)


def _default_tile_rows(rows, lane_features, itemsize, budget_bytes):
    """Largest row tile whose per-step footprint fits the budget.

    Per-row footprint = double-buffered in+out I/O tiles (2*2*itemsize*F)
    plus ~2 full-tile f32 temporaries for the in-kernel math (8*F).
    """
    sub = _sublane_multiple(itemsize)
    bytes_per_row = (4 * int(itemsize) + 8) * int(lane_features)
    t = budget_bytes // max(bytes_per_row, 1)
    if t >= rows:
        return int(rows)                 # single block covering full extent
    t = (t // sub) * sub
    if t <= 0:
        t = min(rows, sub)
    return int(max(t, 1))


# ----------------------------- public wrapper --------------------------------


def layer_norm(
    x,
    a_2,
    b_2,
    eps=1e-6,
    *,
    tile_rows=None,
    vmem_limit_bytes=None,
    approx_recip=False,
    allow_packing=True,
):
    """LayerNorm over the last axis of x. x: (..., F); a_2, b_2: (F,)."""
    orig_shape = x.shape
    features = int(orig_shape[-1])
    rows = 1
    for d in orig_shape[:-1]:
        rows *= int(d)

    if vmem_limit_bytes is None:
        vmem_limit_bytes = _vmem_limit_bytes()
    vmem_limit_bytes = int(vmem_limit_bytes)
    io_budget = (vmem_limit_bytes * 3) // 4  # headroom for a/b tiles, bookkeeping

    itemsize = jnp.dtype(x.dtype).itemsize

    # Small-F lane packing: pack k = 128 // F logical rows per 128-lane row.
    pack = 1
    if allow_packing and features < _LANES and _LANES % features == 0:
        pack = _LANES // features

    if pack > 1:
        rows_p = pl.cdiv(rows, pack)
        pad = rows_p * pack - rows
        x2d = x.reshape(rows, features)
        if pad:
            x2d = jnp.concatenate(
                [x2d, jnp.zeros((pad, features), x.dtype)], axis=0)
        x2d = x2d.reshape(rows_p, pack * features)
        a2d = jnp.tile(a_2.reshape(1, features), (1, pack))
        b2d = jnp.tile(b_2.reshape(1, features), (1, pack))
        lane_features = pack * features
        nrows = int(rows_p)
        kernel = functools.partial(
            _layernorm_packed_kernel, eps=eps, features=features, pack=pack,
            approx_recip=approx_recip)
    else:
        x2d = x.reshape(rows, features)
        a2d = a_2.reshape(1, features)
        b2d = b_2.reshape(1, features)
        lane_features = features
        nrows = rows
        kernel = functools.partial(
            _layernorm_kernel, eps=eps, approx_recip=approx_recip)

    sub = _sublane_multiple(itemsize)
    if tile_rows is None:
        tr = _default_tile_rows(nrows, lane_features, itemsize, io_budget)
    else:
        tr = min(int(tile_rows), nrows)
        if tr != nrows:
            # Keep the sublane dim aligned unless the block covers full extent.
            tr = max((tr // sub) * sub, min(nrows, sub))
    grid = (pl.cdiv(nrows, tr),)  # uneven last block is write-masked by Pallas

    out = pl.pallas_call(
        kernel,
        out_shape=jax.ShapeDtypeStruct((nrows, lane_features), x.dtype),
        grid_spec=pltpu.PrefetchScalarGridSpec(
            num_scalar_prefetch=0,
            grid=grid,
            in_specs=[
                pl.BlockSpec((tr, lane_features), lambda i: (i, 0)),
                pl.BlockSpec((1, lane_features), lambda i: (0, 0)),
                pl.BlockSpec((1, lane_features), lambda i: (0, 0)),
            ],
            out_specs=pl.BlockSpec((tr, lane_features), lambda i: (i, 0)),
        ),
        compiler_params=pltpu.CompilerParams(
            # TODO(synk): on v7x, if xprof shows only one TC busy, switch this
            # axis to pltpu.CORE_PARALLEL.
            dimension_semantics=("parallel",),
            vmem_limit_bytes=vmem_limit_bytes,
        ),
    )(x2d, a2d, b2d)

    if pack > 1:
        out = out.reshape(nrows * pack, features)[:rows]
    return out.reshape(orig_shape)


# ----------------------------- reference & tests ------------------------------


def _reference(x, a_2, b_2, eps):
    """Pure-JAX reference with identical (torch .std) semantics, in f32."""
    xf = x.astype(jnp.float32)
    n = x.shape[-1]
    mean = jnp.mean(xf, axis=-1, keepdims=True)
    std = jnp.sqrt(jnp.sum((xf - mean) ** 2, axis=-1, keepdims=True) / (n - 1))
    return a_2.astype(jnp.float32) * (xf - mean) / (std + eps) + b_2.astype(jnp.float32)


if __name__ == "__main__":
    eps = 1e-6
    key = jax.random.PRNGKey(0)

    # --- Test 1: the module's small demo shape (B=2, S=8, F=32) --------------
    # F=32 < 128 -> exercises the lane-packed path (4 rows per 128-lane vreg).
    batch, seq, hidden = 2, 8, 32
    kx, ka, kb, k2, k3 = jax.random.split(key, 5)
    x = jax.random.normal(kx, (batch, seq, hidden), dtype=jnp.float32)
    a_2 = jnp.ones((hidden,), jnp.float32) + 0.1 * jax.random.normal(
        ka, (hidden,), dtype=jnp.float32)
    b_2 = jnp.zeros((hidden,), jnp.float32) + 0.1 * jax.random.normal(
        kb, (hidden,), dtype=jnp.float32)

    out = jax.block_until_ready(layer_norm(x, a_2, b_2, eps=eps))
    ref = _reference(x, a_2, b_2, eps)
    assert out.shape == x.shape and out.dtype == x.dtype
    assert jnp.allclose(out, ref, atol=1e-4, rtol=1e-4)

    # --- Test 2: F >= 128, multi-block grid (pipelining + masked last block) -
    b2s, s2s, f2 = 3, 41, 256          # rows = 123: not a multiple of tile_rows
    kx2, ka2, kb2 = jax.random.split(k2, 3)
    x2 = jax.random.normal(kx2, (b2s, s2s, f2), dtype=jnp.float32)
    g2 = jnp.ones((f2,), jnp.float32) + 0.1 * jax.random.normal(ka2, (f2,), jnp.float32)
    h2 = 0.1 * jax.random.normal(kb2, (f2,), jnp.float32)

    out2 = jax.block_until_ready(layer_norm(x2, g2, h2, eps=eps, tile_rows=64))
    ref2 = _reference(x2, g2, h2, eps)
    assert out2.shape == x2.shape and out2.dtype == x2.dtype
    assert jnp.allclose(out2, ref2, atol=1e-4, rtol=1e-4)

    # --- Test 3: packed path with row padding (rows=15 not a multiple of k=2)
    b3s, s3s, f3 = 3, 5, 64
    kx3, ka3, kb3 = jax.random.split(k3, 3)
    x3 = jax.random.normal(kx3, (b3s, s3s, f3), dtype=jnp.float32)
    g3 = jnp.ones((f3,), jnp.float32) + 0.1 * jax.random.normal(ka3, (f3,), jnp.float32)
    h3 = 0.1 * jax.random.normal(kb3, (f3,), jnp.float32)

    out3 = jax.block_until_ready(layer_norm(x3, g3, h3, eps=eps))
    ref3 = _reference(x3, g3, h3, eps)
    assert out3.shape == x3.shape and out3.dtype == x3.dtype
    assert jnp.allclose(out3, ref3, atol=1e-4, rtol=1e-4)

    print("KERNEL_OK")
</pallas_src>

<mosaic_0001>
module attributes {stable_mosaic.version = 11 : i64} {
  func.func @_layernorm_packed_kernel(%arg0: i32, %arg1: memref<4x128xf32, #tpu.memory_space<vmem>>, %arg2: memref<1x128xf32, #tpu.memory_space<vmem>>, %arg3: memref<1x128xf32, #tpu.memory_space<vmem>>, %arg4: memref<4x128xf32, #tpu.memory_space<vmem>>) attributes {dimension_semantics = [#tpu.dimension_semantics<parallel>], iteration_bounds = array<i64: 1>, scalar_prefetch = 0 : i64, scratch_operands = 0 : i64, tpu.core_type = #tpu.core_type<tc>, window_params = [{transform_indices = @transform_0, window_bounds = array<i64: 4, 128>}, {pipeline_mode = #tpu.pipeline_mode<synchronous>, transform_indices = @transform_1, window_bounds = array<i64: 1, 128>}, {pipeline_mode = #tpu.pipeline_mode<synchronous>, transform_indices = @transform_2, window_bounds = array<i64: 1, 128>}, {transform_indices = @transform_3, window_bounds = array<i64: 4, 128>}]} {
    %c0 = arith.constant 0 : index
    %c0_0 = arith.constant 0 : index
    %0 = vector.load %arg1[%c0, %c0_0] : memref<4x128xf32, #tpu.memory_space<vmem>>, vector<4x128xf32>
    %c0_1 = arith.constant 0 : index
    %c0_2 = arith.constant 0 : index
    %1 = vector.load %arg2[%c0_1, %c0_2] : memref<1x128xf32, #tpu.memory_space<vmem>>, vector<1x128xf32>
    %c0_3 = arith.constant 0 : index
    %c0_4 = arith.constant 0 : index
    %2 = vector.load %arg3[%c0_3, %c0_4] : memref<1x128xf32, #tpu.memory_space<vmem>>, vector<1x128xf32>
    %3 = vector.extract_strided_slice %0 {offsets = [0, 0], sizes = [4, 32], strides = [1, 1]} : vector<4x128xf32> to vector<4x32xf32>
    %4 = vector.extract_strided_slice %1 {offsets = [0, 0], sizes = [1, 32], strides = [1, 1]} : vector<1x128xf32> to vector<1x32xf32>
    %5 = vector.extract_strided_slice %2 {offsets = [0, 0], sizes = [1, 32], strides = [1, 1]} : vector<1x128xf32> to vector<1x32xf32>
    %cst = arith.constant dense<0.000000e+00> : vector<4xf32>
    %6 = vector.multi_reduction <add>, %3, %cst [1] : vector<4x32xf32> to vector<4xf32>
    %7 = vector.shape_cast %6 : vector<4xf32> to vector<4x1xf32>
    %cst_5 = arith.constant 3.125000e-02 : f32
    %8 = vector.broadcast %cst_5 : f32 to vector<4x1xf32>
    %9 = arith.mulf %7, %8 : vector<4x1xf32>
    %10 = vector.broadcast %9 : vector<4x1xf32> to vector<4x32xf32>
    %11 = arith.subf %3, %10 : vector<4x32xf32>
    %12 = vector.broadcast %9 : vector<4x1xf32> to vector<4x32xf32>
    %13 = arith.subf %3, %12 : vector<4x32xf32>
    %14 = arith.mulf %11, %13 : vector<4x32xf32>
    %cst_6 = arith.constant dense<0.000000e+00> : vector<4xf32>
    %15 = vector.multi_reduction <add>, %14, %cst_6 [1] : vector<4x32xf32> to vector<4xf32>
    %16 = vector.shape_cast %15 : vector<4xf32> to vector<4x1xf32>
    %cst_7 = arith.constant 0.0322580636 : f32
    %17 = vector.broadcast %cst_7 : f32 to vector<4x1xf32>
    %18 = arith.mulf %16, %17 : vector<4x1xf32>
    %19 = math.sqrt %18 : vector<4x1xf32>
    %cst_8 = arith.constant 9.99999997E-7 : f32
    %20 = vector.broadcast %cst_8 : f32 to vector<4x1xf32>
    %21 = arith.addf %19, %20 : vector<4x1xf32>
    %cst_9 = arith.constant 1.000000e+00 : f32
    %22 = vector.broadcast %cst_9 : f32 to vector<4x1xf32>
    %23 = arith.divf %22, %21 : vector<4x1xf32>
    %24 = vector.broadcast %9 : vector<4x1xf32> to vector<4x32xf32>
    %25 = arith.subf %3, %24 : vector<4x32xf32>
    %26 = vector.broadcast %23 : vector<4x1xf32> to vector<4x32xf32>
    %27 = arith.mulf %25, %26 : vector<4x32xf32>
    %28 = vector.broadcast %4 : vector<1x32xf32> to vector<4x32xf32>
    %29 = arith.mulf %27, %28 : vector<4x32xf32>
    %30 = vector.broadcast %5 : vector<1x32xf32> to vector<4x32xf32>
    %31 = arith.addf %29, %30 : vector<4x32xf32>
    %32 = vector.extract_strided_slice %0 {offsets = [0, 32], sizes = [4, 32], strides = [1, 1]} : vector<4x128xf32> to vector<4x32xf32>
    %33 = vector.extract_strided_slice %1 {offsets = [0, 32], sizes = [1, 32], strides = [1, 1]} : vector<1x128xf32> to vector<1x32xf32>
    %34 = vector.extract_strided_slice %2 {offsets = [0, 32], sizes = [1, 32], strides = [1, 1]} : vector<1x128xf32> to vector<1x32xf32>
    %cst_10 = arith.constant dense<0.000000e+00> : vector<4xf32>
    %35 = vector.multi_reduction <add>, %32, %cst_10 [1] : vector<4x32xf32> to vector<4xf32>
    %36 = vector.shape_cast %35 : vector<4xf32> to vector<4x1xf32>
    %cst_11 = arith.constant 3.125000e-02 : f32
    %37 = vector.broadcast %cst_11 : f32 to vector<4x1xf32>
    %38 = arith.mulf %36, %37 : vector<4x1xf32>
    %39 = vector.broadcast %38 : vector<4x1xf32> to vector<4x32xf32>
    %40 = arith.subf %32, %39 : vector<4x32xf32>
    %41 = vector.broadcast %38 : vector<4x1xf32> to vector<4x32xf32>
    %42 = arith.subf %32, %41 : vector<4x32xf32>
    %43 = arith.mulf %40, %42 : vector<4x32xf32>
    %cst_12 = arith.constant dense<0.000000e+00> : vector<4xf32>
    %44 = vector.multi_reduction <add>, %43, %cst_12 [1] : vector<4x32xf32> to vector<4xf32>
    %45 = vector.shape_cast %44 : vector<4xf32> to vector<4x1xf32>
    %cst_13 = arith.constant 0.0322580636 : f32
    %46 = vector.broadcast %cst_13 : f32 to vector<4x1xf32>
    %47 = arith.mulf %45, %46 : vector<4x1xf32>
    %48 = math.sqrt %47 : vector<4x1xf32>
    %cst_14 = arith.constant 9.99999997E-7 : f32
    %49 = vector.broadcast %cst_14 : f32 to vector<4x1xf32>
    %50 = arith.addf %48, %49 : vector<4x1xf32>
    %cst_15 = arith.constant 1.000000e+00 : f32
    %51 = vector.broadcast %cst_15 : f32 to vector<4x1xf32>
    %52 = arith.divf %51, %50 : vector<4x1xf32>
    %53 = vector.broadcast %38 : vector<4x1xf32> to vector<4x32xf32>
    %54 = arith.subf %32, %53 : vector<4x32xf32>
    %55 = vector.broadcast %52 : vector<4x1xf32> to vector<4x32xf32>
    %56 = arith.mulf %54, %55 : vector<4x32xf32>
    %57 = vector.broadcast %33 : vector<1x32xf32> to vector<4x32xf32>
    %58 = arith.mulf %56, %57 : vector<4x32xf32>
    %59 = vector.broadcast %34 : vector<1x32xf32> to vector<4x32xf32>
    %60 = arith.addf %58, %59 : vector<4x32xf32>
    %61 = vector.extract_strided_slice %0 {offsets = [0, 64], sizes = [4, 32], strides = [1, 1]} : vector<4x128xf32> to vector<4x32xf32>
    %62 = vector.extract_strided_slice %1 {offsets = [0, 64], sizes = [1, 32], strides = [1, 1]} : vector<1x128xf32> to vector<1x32xf32>
    %63 = vector.extract_strided_slice %2 {offsets = [0, 64], sizes = [1, 32], strides = [1, 1]} : vector<1x128xf32> to vector<1x32xf32>
    %cst_16 = arith.constant dense<0.000000e+00> : vector<4xf32>
    %64 = vector.multi_reduction <add>, %61, %cst_16 [1] : vector<4x32xf32> to vector<4xf32>
    %65 = vector.shape_cast %64 : vector<4xf32> to vector<4x1xf32>
    %cst_17 = arith.constant 3.125000e-02 : f32
    %66 = vector.broadcast %cst_17 : f32 to vector<4x1xf32>
    %67 = arith.mulf %65, %66 : vector<4x1xf32>
    %68 = vector.broadcast %67 : vector<4x1xf32> to vector<4x32xf32>
    %69 = arith.subf %61, %68 : vector<4x32xf32>
    %70 = vector.broadcast %67 : vector<4x1xf32> to vector<4x32xf32>
    %71 = arith.subf %61, %70 : vector<4x32xf32>
    %72 = arith.mulf %69, %71 : vector<4x32xf32>
    %cst_18 = arith.constant dense<0.000000e+00> : vector<4xf32>
    %73 = vector.multi_reduction <add>, %72, %cst_18 [1] : vector<4x32xf32> to vector<4xf32>
    %74 = vector.shape_cast %73 : vector<4xf32> to vector<4x1xf32>
    %cst_19 = arith.constant 0.0322580636 : f32
    %75 = vector.broadcast %cst_19 : f32 to vector<4x1xf32>
    %76 = arith.mulf %74, %75 : vector<4x1xf32>
    %77 = math.sqrt %76 : vector<4x1xf32>
    %cst_20 = arith.constant 9.99999997E-7 : f32
    %78 = vector.broadcast %cst_20 : f32 to vector<4x1xf32>
    %79 = arith.addf %77, %78 : vector<4x1xf32>
    %cst_21 = arith.constant 1.000000e+00 : f32
    %80 = vector.broadcast %cst_21 : f32 to vector<4x1xf32>
    %81 = arith.divf %80, %79 : vector<4x1xf32>
    %82 = vector.broadcast %67 : vector<4x1xf32> to vector<4x32xf32>
    %83 = arith.subf %61, %82 : vector<4x32xf32>
    %84 = vector.broadcast %81 : vector<4x1xf32> to vector<4x32xf32>
    %85 = arith.mulf %83, %84 : vector<4x32xf32>
    %86 = vector.broadcast %62 : vector<1x32xf32> to vector<4x32xf32>
    %87 = arith.mulf %85, %86 : vector<4x32xf32>
    %88 = vector.broadcast %63 : vector<1x32xf32> to vector<4x32xf32>
    %89 = arith.addf %87, %88 : vector<4x32xf32>
    %90 = vector.extract_strided_slice %0 {offsets = [0, 96], sizes = [4, 32], strides = [1, 1]} : vector<4x128xf32> to vector<4x32xf32>
    %91 = vector.extract_strided_slice %1 {offsets = [0, 96], sizes = [1, 32], strides = [1, 1]} : vector<1x128xf32> to vector<1x32xf32>
    %92 = vector.extract_strided_slice %2 {offsets = [0, 96], sizes = [1, 32], strides = [1, 1]} : vector<1x128xf32> to vector<1x32xf32>
    %cst_22 = arith.constant dense<0.000000e+00> : vector<4xf32>
    %93 = vector.multi_reduction <add>, %90, %cst_22 [1] : vector<4x32xf32> to vector<4xf32>
    %94 = vector.shape_cast %93 : vector<4xf32> to vector<4x1xf32>
    %cst_23 = arith.constant 3.125000e-02 : f32
    %95 = vector.broadcast %cst_23 : f32 to vector<4x1xf32>
    %96 = arith.mulf %94, %95 : vector<4x1xf32>
    %97 = vector.broadcast %96 : vector<4x1xf32> to vector<4x32xf32>
    %98 = arith.subf %90, %97 : vector<4x32xf32>
    %99 = vector.broadcast %96 : vector<4x1xf32> to vector<4x32xf32>
    %100 = arith.subf %90, %99 : vector<4x32xf32>
    %101 = arith.mulf %98, %100 : vector<4x32xf32>
    %cst_24 = arith.constant dense<0.000000e+00> : vector<4xf32>
    %102 = vector.multi_reduction <add>, %101, %cst_24 [1] : vector<4x32xf32> to vector<4xf32>
    %103 = vector.shape_cast %102 : vector<4xf32> to vector<4x1xf32>
    %cst_25 = arith.constant 0.0322580636 : f32
    %104 = vector.broadcast %cst_25 : f32 to vector<4x1xf32>
    %105 = arith.mulf %103, %104 : vector<4x1xf32>
    %106 = math.sqrt %105 : vector<4x1xf32>
    %cst_26 = arith.constant 9.99999997E-7 : f32
    %107 = vector.broadcast %cst_26 : f32 to vector<4x1xf32>
    %108 = arith.addf %106, %107 : vector<4x1xf32>
    %cst_27 = arith.constant 1.000000e+00 : f32
    %109 = vector.broadcast %cst_27 : f32 to vector<4x1xf32>
    %110 = arith.divf %109, %108 : vector<4x1xf32>
    %111 = vector.broadcast %96 : vector<4x1xf32> to vector<4x32xf32>
    %112 = arith.subf %90, %111 : vector<4x32xf32>
    %113 = vector.broadcast %110 : vector<4x1xf32> to vector<4x32xf32>
    %114 = arith.mulf %112, %113 : vector<4x32xf32>
    %115 = vector.broadcast %91 : vector<1x32xf32> to vector<4x32xf32>
    %116 = arith.mulf %114, %115 : vector<4x32xf32>
    %117 = vector.broadcast %92 : vector<1x32xf32> to vector<4x32xf32>
    %118 = arith.addf %116, %117 : vector<4x32xf32>
    %119 = tpu.concatenate %31, %60, %89, %118 in 1 : vector<4x32xf32>, vector<4x32xf32>, vector<4x32xf32>, vector<4x32xf32> -> vector<4x128xf32>
    %c0_28 = arith.constant 0 : index
    %c0_29 = arith.constant 0 : index
    %120 = vector.load %arg4[%c0_28, %c0_29] : memref<4x128xf32, #tpu.memory_space<vmem>>, vector<4x128xf32>
    tpu.vector_store %arg4[%c0_28, %c0_29], %119 {strides = array<i32>} : memref<4x128xf32, #tpu.memory_space<vmem>>, vector<4x128xf32>,
    return
  }
  func.func @transform_0(%arg0: i32) -> (i32, i32) {
    %c0_i32 = arith.constant 0 : i32
    %c0_i32_0 = arith.constant 0 : i32
    return %arg0, %c0_i32 : i32, i32
  }
  func.func @transform_1(%arg0: i32) -> (i32, i32) {
    %c0_i32 = arith.constant 0 : i32
    %c0_i32_0 = arith.constant 0 : i32
    %c0_i32_1 = arith.constant 0 : i32
    return %c0_i32, %c0_i32_0 : i32, i32
  }
  func.func @transform_2(%arg0: i32) -> (i32, i32) {
    %c0_i32 = arith.constant 0 : i32
    %c0_i32_0 = arith.constant 0 : i32
    %c0_i32_1 = arith.constant 0 : i32
    return %c0_i32, %c0_i32_0 : i32, i32
  }
  func.func @transform_3(%arg0: i32) -> (i32, i32) {
    %c0_i32 = arith.constant 0 : i32
    %c0_i32_0 = arith.constant 0 : i32
    return %arg0, %c0_i32 : i32, i32
  }
}

</mosaic_0001>

<bundles_post_ra>
// kernel: tpu_custom_call.1
= control target key start
LH: loop header
LB: loop body
LE: loop exit
PB: predicated region body
PF: predicated region fallthrough
CT: control target
= control target key end

     0   :  { %8 = vsyncpa [#allocation3], 0  ;;  %s333_s0 = inlined_call_operand.hbm [shape: f32[4,128], index: 0, kind: input, shape index: {}]   ;;  %s334_s1 = inlined_call_operand.vmem [shape: f32[1,128], index: 1, kind: input, shape index: {}]   ;;  %s335_s2 = inlined_call_operand.vmem [shape: f32[1,128], index: 2, kind: input, shape index: {}]   ;;  %s336_s3 = inlined_call_operand.hbm [shape: f32[4,128], index: 3, kind: output, shape index: {}]  }
   0x1   :  { %9 = vsyncpa [#allocation4], 0  ;;  %s250_s12 = smov [#allocation2]   ;;  %s202_s16 = scalar_lea.hbm %s333_s0, 64 }
   0x2   :  { %s16_s13 = sshll.u32 %s250_s12, 4  ;;  %p203_p0 = scmp.ne.s32.totalorder %s333_s0, %s202_s16  ;;  %s17_s13 = int_to_ptr.vmem [resolvable:$true] %s16_s13 }
   0x3   :  { %p206_p1 = scmp.lt.u32.totalorder %s202_s16, %s333_s0 }
   0x5   :  { %p208_p2 = pnand %p206_p1, %p203_p0 }
   0x7   :  { %211 = shalt.err (!%p208_p2)
}
   0x8   :  { %s212_s21 = scalar_lea.vmem %s17_s13, 64  ;;  %p217_p4 = scmp.lt.s32.totalorder %s17_s13, %s17_s13 }
   0x9   :  { %p213_p3 = scmp.ne.s32.totalorder %s17_s13, %s212_s21  ;;  %p218_p5 = scmp.lt.s32.totalorder %s212_s21, %s212_s21 }
   0xb   :  { %p219_p6 = por %p218_p5, %p217_p4 }
   0xd   :  { %p220_p7 = pnand %p219_p6, %p213_p3 }
   0xf   :  { %223 = shalt.err (!%p220_p7)
}
  0x10   :  { %19 = dma.hbm_to_vmem [thread:$0]  %s333_s0, 64, %s17_s13, [#allocation3]  }
  0x11   :  { %246 = dma.done.wait [#allocation3], 64  }
  0x12   :  { %247 = vsyncadd [#allocation3], 4294967232  ;;  %v27_v0 = vld [vmem:[#allocation2] sm:$0xf]  ;;  %s251_s24 = smov 96   ;;  %s252_s25 = smov 32  }
  0x13   :  { %67 = vrot.lane.b32.xlu0 %v27_v0, %s251_s24  ;;  %127 = vrot.lane.b32.xlu1 %v27_v0, %s252_s25  ;;  %s253_s26 = smov 64   ;;  %vm30_vm0 = vcmask 257024   ;;  %vm157_vm9 = vcmask 261120   ;;  %vm159_vm10 = vcmask 523264   ;;  %s254_s30 = smov [#allocation5]   ;;  %vm161_vm11 = vcmask 785408  }
  0x14   :  { %v31_v3 = vsel %vm30_vm0, %v27_v0, 0.0 }
  0x17   :  { %97 = vrot.lane.b32.xlu0 %v27_v0, %s253_s26 }
  0x85   :  { %v68_v1 = vpop.permute.xlu0 %67  ;;  %v128_v5 = vpop.permute.xlu1 %127 }
  0x86   :  { %v70_v2 = vsel %vm30_vm0, %v68_v1, 0.0  ;;  %v130_v7 = vsel %vm30_vm0, %v128_v5, 0.0 }
  0x87   :  { %71 = vadd.xlane.f32.xlu1 %v70_v2 }
  0x89   :  { %v98_v4 = vpop.permute.xlu0 %97 }
  0x8a   :  { %v100_v6 = vsel %vm30_vm0, %v98_v4, 0.0  ;;  %v179_v4 = vld [vmem:[%s334_s1] ss:$0 sm:$0xff]  ;;  %s170_s1 = sshll.u32 %s254_s30, 4  ;;  %s171_s1 = int_to_ptr.vmem [resolvable:$true] %s170_s1 }
  0x8b   :  { %101 = vadd.xlane.f32.xlu0 %v100_v6  ;;  %32 = vadd.xlane.f32.xlu1 %v31_v3  ;;  %s224_s4 = scalar_lea.vmem %s171_s1, 64  ;;  %p229_p9 = scmp.lt.s32.totalorder %s171_s1, %s171_s1 }
  0x8c   :  { %p225_p8 = scmp.ne.s32.totalorder %s171_s1, %s224_s4  ;;  %p230_p10 = scmp.lt.s32.totalorder %s224_s4, %s224_s4 }
  0x8e   :  { %p231_p11 = por %p230_p10, %p229_p9 }
  0x8f   :  { %131 = vadd.xlane.f32.xlu0 %v130_v7 }
  0x90   :  { %p232_p12 = pnand %p231_p11, %p225_p8 }
 0x114   :  { %v72_v8 = vpop.xlane.xlu1 %71 }
 0x115   :  { %v73_v9 = vmul.f32 0.03125, %v72_v8 }
 0x117   :  { %v291_v10 = vsub.f32 %v27_v0, %v73_v9 }
 0x118   :  { %v102_v11 = vpop.xlane.xlu0 %101  ;;  %v33_v20 = vpop.xlane.xlu1 %32 }
 0x119   :  { %v103_v12 = vmul.f32 0.03125, %v102_v11  ;;  %v75_v13 = vmul.f32 %v291_v10, %v291_v10  ;;  %v34_v21 = vmul.f32 0.03125, %v33_v20  ;;  %v180_v11 = vld [vmem:[%s335_s2] ss:$0 sm:$0xff] }
 0x11b   :  { %v295_v14 = vsub.f32 %v27_v0, %v103_v12  ;;  %77 = vrot.lane.b32.xlu0 %v75_v13, %s251_s24  ;;  %v303_v22 = vsub.f32 %v27_v0, %v34_v21 }
 0x11c   :  { %v132_v15 = vpop.xlane.xlu0 %131 }
 0x11d   :  { %v133_v16 = vmul.f32 0.03125, %v132_v15  ;;  %v105_v17 = vmul.f32 %v295_v14, %v295_v14  ;;  %v36_v23 = vmul.f32 %v303_v22, %v303_v22 }
 0x11f   :  { %v299_v18 = vsub.f32 %v27_v0, %v133_v16  ;;  %107 = vrot.lane.b32.xlu1 %v105_v17, %s253_s26  ;;  %v37_v24 = vsel %vm30_vm0, %v36_v23, 0.0 }
 0x121   :  { %v135_v19 = vmul.f32 %v299_v18, %v299_v18 }
 0x123   :  { %137 = vrot.lane.b32.xlu1 %v135_v19, %s252_s25 }
 0x13a   :  { %38 = vadd.xlane.f32.xlu0 %v37_v24 }
 0x18d   :  { %v78_v25 = vpop.permute.xlu0 %77 }
 0x18e   :  { %v80_v26 = vsel %vm30_vm0, %v78_v25, 0.0 }
 0x18f   :  { %81 = vadd.xlane.f32.xlu1 %v80_v26 }
 0x191   :  { %v108_v27 = vpop.permute.xlu1 %107 }
 0x192   :  { %v110_v28 = vsel %vm30_vm0, %v108_v27, 0.0 }
 0x193   :  { %111 = vadd.xlane.f32.xlu0 %v110_v28 }
 0x195   :  { %v138_v29 = vpop.permute.xlu1 %137 }
 0x196   :  { %v140_v30 = vsel %vm30_vm0, %v138_v29, 0.0 }
 0x197   :  { %141 = vadd.xlane.f32.xlu0 %v140_v30 }
 0x1c7   :  { %v39_v31 = vpop.xlane.xlu0 %38 }
 0x1c8   :  { %v40_v32 = vmul.f32 0.032258064, %v39_v31 }
 0x1ca   :  { %186 = vrsqrt.f32 %v40_v32  ;;  %vm43_vm1 = vcmp.eq.f32.partialorder %v40_v32, inf  ;;  %v46_v39 = vand.u32 2147483648, %v40_v32  ;;  %vm45_vm2 = vcmp.eq.f32.partialorder %v40_v32, 0.0 }
 0x1d4   :  { %v187_v35 = vpop.eup %186 }
 0x1d5   :  { %v42_v37 = vmul.f32 %v187_v35, %v40_v32 }
 0x1d7   :  { %v44_v41 = vsel %vm43_vm1, %v40_v32, %v42_v37 }
 0x1d8   :  { %v47_v43 = vsel %vm45_vm2, %v46_v39, %v44_v41 }
 0x1d9   :  { %v48_v46 = vadd.f32 1e-06, %v47_v43 }
 0x21c   :  { %v82_v33 = vpop.xlane.xlu1 %81 }
 0x21d   :  { %v83_v34 = vmul.f32 0.032258064, %v82_v33 }
 0x21f   :  { %188 = vrsqrt.f32 %v83_v34  ;;  %vm86_vm3 = vcmp.eq.f32.partialorder %v83_v34, inf  ;;  %v89_v47 = vand.u32 2147483648, %v83_v34  ;;  %vm88_vm4 = vcmp.eq.f32.partialorder %v83_v34, 0.0 }
 0x220   :  { %v112_v36 = vpop.xlane.xlu0 %111 }
 0x221   :  { %v113_v38 = vmul.f32 0.032258064, %v112_v36 }
 0x223   :  { %190 = vrsqrt.f32 %v113_v38  ;;  %vm116_vm5 = vcmp.eq.f32.partialorder %v113_v38, inf  ;;  %v119_v53 = vand.u32 2147483648, %v113_v38  ;;  %vm118_vm6 = vcmp.eq.f32.partialorder %v113_v38, 0.0 }
 0x224   :  { %v142_v40 = vpop.xlane.xlu0 %141 }
 0x225   :  { %v143_v42 = vmul.f32 0.032258064, %v142_v40 }
 0x227   :  { %192 = vrsqrt.f32 %v143_v42  ;;  %vm146_vm7 = vcmp.eq.f32.partialorder %v143_v42, inf  ;;  %v149_v59 = vand.u32 2147483648, %v143_v42  ;;  %vm148_vm8 = vcmp.eq.f32.partialorder %v143_v42, 0.0 }
 0x228   :  { %194 = vrcp.f32 %v48_v46 }
 0x229   :  { %v189_v44 = vpop.eup %188 }
 0x22a   :  { %v85_v45 = vmul.f32 %v189_v44, %v83_v34 }
 0x22c   :  { %v87_v48 = vsel %vm86_vm3, %v83_v34, %v85_v45 }
 0x22d   :  { %v191_v49 = vpop.eup %190  ;;  %v90_v50 = vsel %vm88_vm4, %v89_v47, %v87_v48 }
 0x22e   :  { %v91_v51 = vadd.f32 1e-06, %v90_v50  ;;  %v115_v52 = vmul.f32 %v191_v49, %v113_v38 }
 0x230   :  { %196 = vrcp.f32 %v91_v51  ;;  %v117_v54 = vsel %vm116_vm5, %v113_v38, %v115_v52 }
 0x231   :  { %v193_v55 = vpop.eup %192  ;;  %v120_v56 = vsel %vm118_vm6, %v119_v53, %v117_v54 }
 0x232   :  { %v121_v57 = vadd.f32 1e-06, %v120_v56  ;;  %v145_v58 = vmul.f32 %v193_v55, %v143_v42  ;;  %v195_v63 = vpop.eup %194 }
 0x233   :  { %v51_v2 = vmul.f32 %v195_v63, %v303_v22 }
 0x234   :  { %198 = vrcp.f32 %v121_v57  ;;  %v147_v60 = vsel %vm146_vm7, %v143_v42, %v145_v58 }
 0x235   :  { %v150_v61 = vsel %vm148_vm8, %v149_v59, %v147_v60  ;;  %v58_v7 = vmul.f32 %v179_v4, %v51_v2 }
 0x236   :  { %v151_v62 = vadd.f32 1e-06, %v150_v61 }
 0x237   :  { %v65_v15 = vadd.f32 %v180_v11, %v58_v7 }
 0x238   :  { %200 = vrcp.f32 %v151_v62 }
 0x23a   :  { %v197_v0 = vpop.eup %196 }
 0x23b   :  { %v94_v1 = vmul.f32 %v197_v0, %v291_v10 }
 0x23d   :  { %v95_v5 = vmul.f32 %v179_v4, %v94_v1 }
 0x23e   :  { %v199_v3 = vpop.eup %198 }
 0x23f   :  { %v124_v6 = vmul.f32 %v199_v3, %v295_v14  ;;  %v96_v12 = vadd.f32 %v180_v11, %v95_v5 }
 0x241   :  { %v125_v8 = vmul.f32 %v179_v4, %v124_v6  ;;  %v158_v14 = vsel %vm157_vm9, %v65_v15, %v96_v12 }
 0x242   :  { %v201_v9 = vpop.eup %200 }
 0x243   :  { %v154_v10 = vmul.f32 %v201_v9, %v299_v18  ;;  %v126_v13 = vadd.f32 %v180_v11, %v125_v8 }
 0x245   :  { %v155_v16 = vmul.f32 %v179_v4, %v154_v10  ;;  %v160_v19 = vsel %vm159_vm10, %v158_v14, %v126_v13 }
 0x247   :  { %v156_v17 = vadd.f32 %v180_v11, %v155_v16 }
 0x249   :  { %v162_v20 = vsel %vm161_vm11, %v160_v19, %v156_v17 }
 0x24a   :  { %163 = vst [vmem:[#allocation5] sm:$0xf] %v162_v20 }
 0x24b   :  { %235 = shalt.err (!%p232_p12)
}
 0x24c   :  { %s236_s6 = scalar_lea.hbm %s336_s3, 64 }
 0x24d   :  { %p237_p13 = scmp.ne.s32.totalorder %s336_s3, %s236_s6  ;;  %p240_p0 = scmp.lt.u32.totalorder %s236_s6, %s336_s3 }
 0x24f   :  { %p242_p1 = pnand %p240_p0, %p237_p13 }
 0x251   :  { %245 = shalt.err (!%p242_p1)
}
 0x252   :  { %173 = dma.vmem_to_hbm [thread:$0]  %s171_s1, 64, %s336_s3, [#allocation4]  }
 0x253   :  { %248 = dma.done.wait [#allocation4], 64  }
 0x254   :  { %249 = vsyncadd [#allocation4], 4294967232 }
 0x255   :  { %177 = vsyncpa [#allocation3], 1 }
 0x256   :  { %178 = vsyncpa [#allocation4], 1 }

</bundles_post_ra>
